<compile_context>
chip_gen: v5e
topology: v5e:2x2
jax: 0.10.0
libtpu: 0.0.40
codegen_flags: <defaults>
</compile_context>

<pallas_src>
import jax
import jax.numpy as jnp
from jax.experimental import pallas as pl
from jax.experimental.pallas import tpu as pltpu


def _copy_kernel(x_ref, o_ref):
    # Straight copy of the current VMEM tile.
    o_ref[...] = x_ref[...]


def dummy_transformer_block(x, *, target_tile_bytes=4 * 1024 * 1024, donate=False):
    """Identity forward pass of DummyTransformerBlock as a Pallas kernel.

    x: any-shaped array. Returns an array equal to x.
    """
    orig_shape = x.shape
    n = x.size
    itemsize = jnp.dtype(x.dtype).itemsize
    io_alias = {0: 0} if donate else {}

    # Widest lane-dense last dim (multiple of 128) that divides the element
    # count -> unmasked, full-width stores.
    lane = next((c for c in (1024, 512, 256, 128) if n % c == 0), None)

    if lane is None:
        # Irregular total size: single whole-array block (full-extent blocks
        # are exempt from the (8,128) divisibility rule).
        return pl.pallas_call(
            _copy_kernel,
            out_shape=jax.ShapeDtypeStruct(x.shape, x.dtype),
            input_output_aliases=io_alias,
        )(x)

    rows = n // lane
    x2 = x.reshape(rows, lane)  # free metadata reshape in the wrapper

    # Sublane packing multiple: 8 rows/vreg for 32-bit, 16 for bf16, 32 for int8.
    sub = max(8, 32 // max(itemsize, 1))

    # Multi-MiB tiles to amortize the ~0.35 us per-grid-step overhead.
    row_tile = max(sub, (target_tile_bytes // (lane * itemsize)) // sub * sub)

    if row_tile >= rows:
        if rows >= 2 * sub:
            # Whole array fits a single target tile: split into >=2 parallel
            # grid steps so v7x's two TensorCores both stream.
            row_tile = ((pl.cdiv(rows, 2) + sub - 1) // sub) * sub
        else:
            # Tiny input: one full-extent block (exempt from (8,128) rule).
            row_tile = rows

    grid = (pl.cdiv(rows, row_tile),)

    y2 = pl.pallas_call(
        _copy_kernel,
        out_shape=jax.ShapeDtypeStruct((rows, lane), x.dtype),
        grid=grid,
        in_specs=[pl.BlockSpec((row_tile, lane), lambda i: (i, 0))],
        out_specs=pl.BlockSpec((row_tile, lane), lambda i: (i, 0)),
        input_output_aliases=io_alias,
        compiler_params=pltpu.CompilerParams(
            dimension_semantics=("parallel",),
            vmem_limit_bytes=32 * 1024 * 1024,
        ),
    )(x2)
    return y2.reshape(orig_shape)


if __name__ == "__main__":
    # DummyTransformerBlock has no parameters, so there is nothing to init.
    key = jax.random.PRNGKey(0)

    # Small GPT-block-like activation shape: [batch, seq, hidden].
    B, S, H = 2, 8, 32
    x = jax.random.normal(key, (B, S, H), dtype=jnp.float32)
    y = jax.block_until_ready(dummy_transformer_block(x))
    assert y.shape == x.shape and y.dtype == x.dtype
    assert bool(jnp.array_equal(y, x))

    # Second check exercising the multi-step tiled path (still small).
    x2 = jax.random.normal(jax.random.PRNGKey(1), (2, 128, 768), dtype=jnp.bfloat16)
    y2 = jax.block_until_ready(dummy_transformer_block(x2))
    assert y2.shape == x2.shape and y2.dtype == x2.dtype
    assert bool(jnp.array_equal(y2, x2))

    print("KERNEL_OK")
</pallas_src>

<mosaic_0001>
module attributes {stable_mosaic.version = 11 : i64} {
  func.func @_copy_kernel(%arg0: i32, %arg1: memref<1x512xf32, #tpu.memory_space<vmem>>, %arg2: memref<1x512xf32, #tpu.memory_space<vmem>>) attributes {dimension_semantics = [#tpu.dimension_semantics<parallel>], iteration_bounds = array<i64: 1>, scalar_prefetch = 0 : i64, scratch_operands = 0 : i64, tpu.core_type = #tpu.core_type<tc>, window_params = [{transform_indices = @transform_0, window_bounds = array<i64: 1, 512>}, {transform_indices = @transform_1, window_bounds = array<i64: 1, 512>}]} {
    %c0 = arith.constant 0 : index
    %c0_0 = arith.constant 0 : index
    %0 = vector.load %arg1[%c0, %c0_0] : memref<1x512xf32, #tpu.memory_space<vmem>>, vector<1x512xf32>
    %c0_1 = arith.constant 0 : index
    %c0_2 = arith.constant 0 : index
    %1 = vector.load %arg2[%c0_1, %c0_2] : memref<1x512xf32, #tpu.memory_space<vmem>>, vector<1x512xf32>
    tpu.vector_store %arg2[%c0_1, %c0_2], %0 {strides = array<i32>} : memref<1x512xf32, #tpu.memory_space<vmem>>, vector<1x512xf32>,
    return
  }
  func.func @transform_0(%arg0: i32) -> (i32, i32) {
    %c0_i32 = arith.constant 0 : i32
    %c0_i32_0 = arith.constant 0 : i32
    return %arg0, %c0_i32 : i32, i32
  }
  func.func @transform_1(%arg0: i32) -> (i32, i32) {
    %c0_i32 = arith.constant 0 : i32
    %c0_i32_0 = arith.constant 0 : i32
    return %arg0, %c0_i32 : i32, i32
  }
}

</mosaic_0001>

<bundles_post_ra>
// kernel: tpu_custom_call.1
= control target key start
LH: loop header
LB: loop body
LE: loop exit
PB: predicated region body
PF: predicated region fallthrough
CT: control target
= control target key end

     0   :  { %6 = vsyncpa [#allocation3], 0  ;;  %s118_s0 = inlined_call_operand.hbm [shape: f32[1,512], index: 0, kind: input, shape index: {}]   ;;  %s119_s1 = inlined_call_operand.hbm [shape: f32[1,512], index: 1, kind: output, shape index: {}]  }
   0x1   :  { %7 = vsyncpa [#allocation4], 0  ;;  %s13_s8 = sshll.u32 %s118_s0, 4  ;;  %s100_s9 = smov [#allocation2]   ;;  %s14_s8 = int_to_ptr.hbm [resolvable:$true] %s13_s8 }
   0x2   :  { %s15_s10 = sshll.u32 %s100_s9, 4  ;;  %s16_s10 = int_to_ptr.vmem [resolvable:$true] %s15_s10 }
   0x3   :  { %18 = dma.hbm_to_vmem [thread:$0]  %s14_s8, 64, %s16_s10, [#allocation3]  }
   0x4   :  { %96 = dma.done.wait [#allocation3], 64  }
   0x5   :  { %97 = vsyncadd [#allocation3], 4294967232  ;;  %v24_v0 = vlaneseq  ;;  %s101_s11 = smov [#allocation5]   ;;  %s36_s15 = sshll.u32 %s119_s1, 4  ;;  %v23_v1 = vld [vmem:[#allocation2] sm:$0xf]  ;;  %s37_s15 = int_to_ptr.hbm [resolvable:$true] %s36_s15 }
   0x6   :  { %s34_s12 = sshll.u32 %s101_s11, 4  ;;  %s35_s12 = int_to_ptr.vmem [resolvable:$true] %s34_s12 }
   0x7   :  { %vm26_vm0 = vcmp.lt.s32.totalorder %v24_v0, 512 }
   0x8   :  { %28 = vst.msk [vmem:[#allocation5] sm:$0xf] %vm26_vm0, %v23_v1 }
   0x9   :  { %39 = dma.vmem_to_hbm [thread:$0]  %s35_s12, 64, %s37_s15, [#allocation4]  }
   0xa   :  { %98 = dma.done.wait [#allocation4], 64  }
   0xb   :  { %99 = vsyncadd [#allocation4], 4294967232 }
   0xc   :  { %44 = vsyncpa [#allocation3], 1 }
   0xd   :  { %45 = vsyncpa [#allocation4], 1 }

</bundles_post_ra>
